<compile_context>
chip_gen: v6e
topology: v6e:2x2x1
jax: 0.10.0
libtpu: 0.0.40
codegen_flags: <defaults>
</compile_context>

<pallas_src>
import functools

import jax
import jax.numpy as jnp
from jax.experimental import pallas as pl
from jax.experimental.pallas import tpu as pltpu


# ----------------------------------------------------------------------------
# Pallas kernel: fused forward pass over one (channels, TM-pixels) tile.
# ----------------------------------------------------------------------------
def _weight_dy_graph_kernel(xn_ref, xw_ref, w_ref, out_ref, *, dims):
    (c2nin, win, cmid, med, wout, r1, r2, r3, r4, bcol) = dims

    xn = xn_ref[...]                       # (c2nin, TM)
    xw = xw_ref[...]                       # (win,   TM)

    n1 = 3 * cmid                          # fused first-layer width
    n2 = 3 * med                           # fused second-layer width

    # --- fused first convs (BN folded) of node/pure/plus + ReLU -------------
    w1n = w_ref[r1:r1 + n1, 0:c2nin]                    # [Wn1; 0; 0]
    w1w = w_ref[r1:r1 + n1, c2nin:c2nin + win]          # [0; Wp1; Wq1]
    b1 = w_ref[r1:r1 + n1, bcol:bcol + 1]
    h = (jnp.dot(w1n, xn, preferred_element_type=jnp.float32)
         + jnp.dot(w1w, xw, preferred_element_type=jnp.float32) + b1)
    h = jnp.maximum(h, 0.0)                              # (3*cmid, TM)

    # --- block-diagonal second convs of the three branches ------------------
    w2 = w_ref[r2:r2 + n2, 0:n1]                         # blockdiag(Wn2,Wp2,Wq2)
    b2 = w_ref[r2:r2 + n2, bcol:bcol + 1]
    f = jnp.dot(w2, h, preferred_element_type=jnp.float32) + b2   # (3*med, TM)

    nfeature = f[0:med]                                  # nodeCnn output
    wf_og = f[med:2 * med]                               # weightCnnPure output
    wf_plus = f[2 * med:3 * med]                         # weightCnnPlus output
    z = wf_og + nfeature * wf_plus                       # (med, TM)

    # --- weightMix: conv (BN folded) -> ReLU -> conv -------------------------
    wm1 = w_ref[r3:r3 + wout, 0:med]
    bm1 = w_ref[r3:r3 + wout, bcol:bcol + 1]
    hm = jnp.maximum(
        jnp.dot(wm1, z, preferred_element_type=jnp.float32) + bm1, 0.0)

    wm2 = w_ref[r4:r4 + wout, 0:wout]
    bm2 = w_ref[r4:r4 + wout, bcol:bcol + 1]
    out_ref[...] = jnp.dot(wm2, hm, preferred_element_type=jnp.float32) + bm2


# ----------------------------------------------------------------------------
# Parameter construction / BN folding (plain-JAX glue).
# ----------------------------------------------------------------------------
def _init_branch_params(key, cin, cmid, cout, eps=1e-5):
    """Conv2d(cin->cmid,1x1) + BN(cmid) + ReLU + Conv2d(cmid->cout,1x1)."""
    ks = jax.random.split(key, 8)
    w1 = jax.random.normal(ks[0], (cmid, cin), jnp.float32) * 0.1     # (Cout, Cin)
    b1 = jax.random.normal(ks[1], (cmid,), jnp.float32) * 0.1
    gamma = 1.0 + 0.1 * jax.random.normal(ks[2], (cmid,), jnp.float32)
    beta = 0.1 * jax.random.normal(ks[3], (cmid,), jnp.float32)
    mean = 0.1 * jax.random.normal(ks[4], (cmid,), jnp.float32)
    var = jnp.abs(1.0 + 0.1 * jax.random.normal(ks[5], (cmid,), jnp.float32))
    w2 = jax.random.normal(ks[6], (cout, cmid), jnp.float32) * 0.1
    b2 = jax.random.normal(ks[7], (cout,), jnp.float32) * 0.1

    # Fold BN (eval mode) into conv1: y = ((W1 x + b1) - mean)/sqrt(var+eps)*gamma + beta
    s = gamma / jnp.sqrt(var + eps)
    w1f = w1 * s[:, None]                                # (Cout, Cin)
    b1f = (b1 - mean) * s + beta                         # (Cout,)
    return dict(w1=w1f, b1=b1f, w2=w2, b2=b2)


def make_params(key, nin, med, win, wout):
    k_node, k_pure, k_plus, k_mix = jax.random.split(key, 4)
    return dict(
        node=_init_branch_params(k_node, 2 * nin, med // 2, med),
        pure=_init_branch_params(k_pure, win, med // 2, med),
        plus=_init_branch_params(k_plus, win, med // 2, med),
        mix=_init_branch_params(k_mix, med, wout, wout),
    )


def _round8(n):
    return ((n + 7) // 8) * 8


def _pack_params(params, c2nin, win):
    """Pack all weights/biases into one 2-D slab + static layout tuple."""
    node, pure, plus, mix = params["node"], params["pure"], params["plus"], params["mix"]
    cmid = node["w1"].shape[0]
    med = node["w2"].shape[0]
    wout = mix["w2"].shape[0]
    cin_tot = c2nin + win

    n1, n2, n3, n4 = 3 * cmid, 3 * med, wout, wout
    r1 = 0
    r2 = r1 + _round8(n1)
    r3 = r2 + _round8(n2)
    r4 = r3 + _round8(n3)
    nrows = r4 + _round8(n4)
    bcol = max(cin_tot, 3 * cmid, med, wout)   # bias column index
    ncols = bcol + 1

    # fused first layer over [xn; xw]
    w1 = jnp.zeros((n1, cin_tot), jnp.float32)
    w1 = w1.at[0:cmid, 0:c2nin].set(node["w1"])
    w1 = w1.at[cmid:2 * cmid, c2nin:].set(pure["w1"])
    w1 = w1.at[2 * cmid:3 * cmid, c2nin:].set(plus["w1"])
    b1 = jnp.concatenate([node["b1"], pure["b1"], plus["b1"]])

    # block-diagonal second layer over [h_node; h_pure; h_plus]
    w2 = jnp.zeros((n2, 3 * cmid), jnp.float32)
    w2 = w2.at[0:med, 0:cmid].set(node["w2"])
    w2 = w2.at[med:2 * med, cmid:2 * cmid].set(pure["w2"])
    w2 = w2.at[2 * med:3 * med, 2 * cmid:3 * cmid].set(plus["w2"])
    b2 = jnp.concatenate([node["b2"], pure["b2"], plus["b2"]])

    slab = jnp.zeros((nrows, ncols), jnp.float32)
    slab = slab.at[r1:r1 + n1, 0:cin_tot].set(w1)
    slab = slab.at[r1:r1 + n1, bcol].set(b1)
    slab = slab.at[r2:r2 + n2, 0:3 * cmid].set(w2)
    slab = slab.at[r2:r2 + n2, bcol].set(b2)
    slab = slab.at[r3:r3 + n3, 0:med].set(mix["w1"])
    slab = slab.at[r3:r3 + n3, bcol].set(mix["b1"])
    slab = slab.at[r4:r4 + n4, 0:wout].set(mix["w2"])
    slab = slab.at[r4:r4 + n4, bcol].set(mix["b2"])

    dims = (c2nin, win, cmid, med, wout, r1, r2, r3, r4, bcol)
    return slab, dims


# ----------------------------------------------------------------------------
# Wrapper: NCHW -> (N, C, HW) reshape (no transpose) + pallas_call.
# ----------------------------------------------------------------------------
@functools.partial(jax.jit, static_argnames=("tm",))
def weight_dy_graph_forward(pair_node_feature, pair_weight, params, tm=512):
    N, c2nin, H, W = pair_node_feature.shape
    _, win, _, _ = pair_weight.shape

    slab, dims = _pack_params(params, c2nin, win)
    wout = dims[4]

    HW = H * W
    # pixel tile: multiple of 128 lanes, no larger than the (padded) image
    tm_eff = min(((tm + 127) // 128) * 128, ((HW + 127) // 128) * 128)
    HWp = ((HW + tm_eff - 1) // tm_eff) * tm_eff

    # NCHW is already channel-major: only free reshapes, no transposes.
    xn = pair_node_feature.reshape(N, c2nin, HW)
    xw = pair_weight.reshape(N, win, HW)
    if HWp != HW:
        pad = HWp - HW
        xn = jnp.pad(xn, ((0, 0), (0, 0), (0, pad)))
        xw = jnp.pad(xw, ((0, 0), (0, 0), (0, pad)))

    grid = (N, HWp // tm_eff)
    kernel = functools.partial(_weight_dy_graph_kernel, dims=dims)

    out = pl.pallas_call(
        kernel,
        out_shape=jax.ShapeDtypeStruct((N, wout, HWp), jnp.float32),
        grid_spec=pltpu.PrefetchScalarGridSpec(
            num_scalar_prefetch=0,
            grid=grid,
            in_specs=[
                pl.BlockSpec((None, c2nin, tm_eff), lambda n, i: (n, 0, i)),
                pl.BlockSpec((None, win, tm_eff), lambda n, i: (n, 0, i)),
                pl.BlockSpec(slab.shape, lambda n, i: (0, 0)),  # resident weights
            ],
            out_specs=pl.BlockSpec((None, wout, tm_eff), lambda n, i: (n, 0, i)),
        ),
        compiler_params=pltpu.CompilerParams(
            dimension_semantics=("parallel", "parallel"),
        ),
    )(xn, xw, slab)

    return out[:, :, :HW].reshape(N, wout, H, W)


# ----------------------------------------------------------------------------
# Pure-JAX reference (for correctness check).
# ----------------------------------------------------------------------------
def reference_forward(pair_node_feature, pair_weight, params):
    hp = jax.lax.Precision.HIGHEST

    def branch(x, p):  # x: (N, Cin, H, W)
        h = jnp.einsum("oc,nchw->nohw", p["w1"], x, precision=hp)
        h = jnp.maximum(h + p["b1"][None, :, None, None], 0.0)
        y = jnp.einsum("oc,nchw->nohw", p["w2"], h, precision=hp)
        return y + p["b2"][None, :, None, None]

    nfeature = branch(pair_node_feature, params["node"])
    wf_og = branch(pair_weight, params["pure"])
    wf_plus = branch(pair_weight, params["plus"])
    return branch(wf_og + nfeature * wf_plus, params["mix"])


# ----------------------------------------------------------------------------
if __name__ == "__main__":
    # Module hyper-parameters (small, consistent with the forward pass).
    nin, med, win, wout = 4, 32, 8, 16
    N, H, W = 2, 16, 16

    key = jax.random.PRNGKey(0)
    k_params, k_xn, k_xw = jax.random.split(key, 3)

    params = make_params(k_params, nin, med, win, wout)
    pair_node_feature = jax.random.normal(k_xn, (N, 2 * nin, H, W), jnp.float32)
    pair_weight = jax.random.normal(k_xw, (N, win, H, W), jnp.float32)

    out = weight_dy_graph_forward(pair_node_feature, pair_weight, params)
    out = jax.block_until_ready(out)

    ref = reference_forward(pair_node_feature, pair_weight, params)
    assert out.shape == (N, wout, H, W), out.shape
    max_err = float(jnp.max(jnp.abs(out - ref)))
    assert jnp.allclose(out, ref, atol=2e-3, rtol=2e-3), f"mismatch vs reference (max abs err {max_err})"

    print("KERNEL_OK")
</pallas_src>

<mosaic_0001>
module attributes {stable_mosaic.version = 11 : i64} {
  func.func @_weight_dy_graph_kernel(%arg0: i32, %arg1: i32, %arg2: memref<1x8x256xf32, #tpu.memory_space<vmem>>, %arg3: memref<1x8x256xf32, #tpu.memory_space<vmem>>, %arg4: memref<176x49xf32, #tpu.memory_space<vmem>>, %arg5: memref<1x16x256xf32, #tpu.memory_space<vmem>>) attributes {dimension_semantics = [#tpu.dimension_semantics<parallel>, #tpu.dimension_semantics<parallel>], iteration_bounds = array<i64: 2, 1>, scalar_prefetch = 0 : i64, scratch_operands = 0 : i64, tpu.core_type = #tpu.core_type<tc>, window_params = [{transform_indices = @transform_0, window_bounds = array<i64: 1, 8, 256>}, {transform_indices = @transform_1, window_bounds = array<i64: 1, 8, 256>}, {pipeline_mode = #tpu.pipeline_mode<synchronous>, transform_indices = @transform_2, window_bounds = array<i64: 176, 49>}, {transform_indices = @transform_3, window_bounds = array<i64: 1, 16, 256>}]} {
    %c0 = arith.constant 0 : index
    %c0_0 = arith.constant 0 : index
    %c0_1 = arith.constant 0 : index
    %0 = vector.load %arg2[%c0, %c0_0, %c0_1] : memref<1x8x256xf32, #tpu.memory_space<vmem>>, vector<1x8x256xf32>
    %1 = vector.shape_cast %0 : vector<1x8x256xf32> to vector<8x256xf32>
    %c0_2 = arith.constant 0 : index
    %c0_3 = arith.constant 0 : index
    %c0_4 = arith.constant 0 : index
    %2 = vector.load %arg3[%c0_2, %c0_3, %c0_4] : memref<1x8x256xf32, #tpu.memory_space<vmem>>, vector<1x8x256xf32>
    %3 = vector.shape_cast %2 : vector<1x8x256xf32> to vector<8x256xf32>
    %c0_5 = arith.constant 0 : index
    %c0_6 = arith.constant 0 : index
    %4 = vector.load %arg4[%c0_5, %c0_6] : memref<176x49xf32, #tpu.memory_space<vmem>>, vector<48x8xf32>
    %c0_7 = arith.constant 0 : index
    %c8 = arith.constant 8 : index
    %5 = vector.load %arg4[%c0_7, %c8] : memref<176x49xf32, #tpu.memory_space<vmem>>, vector<48x8xf32>
    %c0_8 = arith.constant 0 : index
    %c48 = arith.constant 48 : index
    %6 = vector.load %arg4[%c0_8, %c48] : memref<176x49xf32, #tpu.memory_space<vmem>>, vector<48x1xf32>
    %cst = arith.constant dense<0.000000e+00> : vector<48x256xf32>
    %7 = tpu.matmul %4, %1, %cst {dimension_numbers = #tpu.dot_dimension_numbers<[1], [0], [0], [1], [0, 0, 1, 1], [], []>} : vector<48x8xf32>, vector<8x256xf32>, vector<48x256xf32> -> vector<48x256xf32>
    %cst_9 = arith.constant dense<0.000000e+00> : vector<48x256xf32>
    %8 = tpu.matmul %5, %3, %cst_9 {dimension_numbers = #tpu.dot_dimension_numbers<[1], [0], [0], [1], [0, 0, 1, 1], [], []>} : vector<48x8xf32>, vector<8x256xf32>, vector<48x256xf32> -> vector<48x256xf32>
    %9 = arith.addf %7, %8 : vector<48x256xf32>
    %10 = vector.broadcast %6 : vector<48x1xf32> to vector<48x256xf32>
    %11 = arith.addf %9, %10 : vector<48x256xf32>
    %cst_10 = arith.constant 0.000000e+00 : f32
    %12 = vector.broadcast %cst_10 : f32 to vector<48x256xf32>
    %13 = arith.maximumf %11, %12 : vector<48x256xf32>
    %c48_11 = arith.constant 48 : index
    %c0_12 = arith.constant 0 : index
    %14 = vector.load %arg4[%c48_11, %c0_12] : memref<176x49xf32, #tpu.memory_space<vmem>>, vector<96x48xf32>
    %c48_13 = arith.constant 48 : index
    %c48_14 = arith.constant 48 : index
    %15 = vector.load %arg4[%c48_13, %c48_14] : memref<176x49xf32, #tpu.memory_space<vmem>>, vector<96x1xf32>
    %cst_15 = arith.constant dense<0.000000e+00> : vector<96x256xf32>
    %16 = tpu.matmul %14, %13, %cst_15 {dimension_numbers = #tpu.dot_dimension_numbers<[1], [0], [0], [1], [0, 0, 1, 1], [], []>} : vector<96x48xf32>, vector<48x256xf32>, vector<96x256xf32> -> vector<96x256xf32>
    %17 = vector.broadcast %15 : vector<96x1xf32> to vector<96x256xf32>
    %18 = arith.addf %16, %17 : vector<96x256xf32>
    %19 = vector.extract_strided_slice %18 {offsets = [0, 0], sizes = [32, 256], strides = [1, 1]} : vector<96x256xf32> to vector<32x256xf32>
    %20 = vector.extract_strided_slice %18 {offsets = [32, 0], sizes = [32, 256], strides = [1, 1]} : vector<96x256xf32> to vector<32x256xf32>
    %21 = vector.extract_strided_slice %18 {offsets = [64, 0], sizes = [32, 256], strides = [1, 1]} : vector<96x256xf32> to vector<32x256xf32>
    %22 = arith.mulf %19, %21 : vector<32x256xf32>
    %23 = arith.addf %20, %22 : vector<32x256xf32>
    %c144 = arith.constant 144 : index
    %c0_16 = arith.constant 0 : index
    %24 = vector.load %arg4[%c144, %c0_16] : memref<176x49xf32, #tpu.memory_space<vmem>>, vector<16x32xf32>
    %c144_17 = arith.constant 144 : index
    %c48_18 = arith.constant 48 : index
    %25 = vector.load %arg4[%c144_17, %c48_18] : memref<176x49xf32, #tpu.memory_space<vmem>>, vector<16x1xf32>
    %cst_19 = arith.constant dense<0.000000e+00> : vector<16x256xf32>
    %26 = tpu.matmul %24, %23, %cst_19 {dimension_numbers = #tpu.dot_dimension_numbers<[1], [0], [0], [1], [0, 0, 1, 1], [], []>} : vector<16x32xf32>, vector<32x256xf32>, vector<16x256xf32> -> vector<16x256xf32>
    %27 = vector.broadcast %25 : vector<16x1xf32> to vector<16x256xf32>
    %28 = arith.addf %26, %27 : vector<16x256xf32>
    %cst_20 = arith.constant 0.000000e+00 : f32
    %29 = vector.broadcast %cst_20 : f32 to vector<16x256xf32>
    %30 = arith.maximumf %28, %29 : vector<16x256xf32>
    %c160 = arith.constant 160 : index
    %c0_21 = arith.constant 0 : index
    %31 = vector.load %arg4[%c160, %c0_21] : memref<176x49xf32, #tpu.memory_space<vmem>>, vector<16x16xf32>
    %c160_22 = arith.constant 160 : index
    %c48_23 = arith.constant 48 : index
    %32 = vector.load %arg4[%c160_22, %c48_23] : memref<176x49xf32, #tpu.memory_space<vmem>>, vector<16x1xf32>
    %cst_24 = arith.constant dense<0.000000e+00> : vector<16x256xf32>
    %33 = tpu.matmul %31, %30, %cst_24 {dimension_numbers = #tpu.dot_dimension_numbers<[1], [0], [0], [1], [0, 0, 1, 1], [], []>} : vector<16x16xf32>, vector<16x256xf32>, vector<16x256xf32> -> vector<16x256xf32>
    %34 = vector.broadcast %32 : vector<16x1xf32> to vector<16x256xf32>
    %35 = arith.addf %33, %34 : vector<16x256xf32>
    %c0_25 = arith.constant 0 : index
    %c0_26 = arith.constant 0 : index
    %c0_27 = arith.constant 0 : index
    %36 = vector.load %arg5[%c0_25, %c0_26, %c0_27] : memref<1x16x256xf32, #tpu.memory_space<vmem>>, vector<1x16x256xf32>
    %37 = vector.shape_cast %36 : vector<1x16x256xf32> to vector<16x256xf32>
    %38 = vector.shape_cast %35 : vector<16x256xf32> to vector<1x16x256xf32>
    tpu.vector_store %arg5[%c0_25, %c0_26, %c0_27], %38 {strides = array<i32>} : memref<1x16x256xf32, #tpu.memory_space<vmem>>, vector<1x16x256xf32>,
    return
  }
  func.func @transform_0(%arg0: i32, %arg1: i32) -> (i32, i32, i32) {
    %c0_i32 = arith.constant 0 : i32
    %c0_i32_0 = arith.constant 0 : i32
    return %arg0, %c0_i32, %arg1 : i32, i32, i32
  }
  func.func @transform_1(%arg0: i32, %arg1: i32) -> (i32, i32, i32) {
    %c0_i32 = arith.constant 0 : i32
    %c0_i32_0 = arith.constant 0 : i32
    return %arg0, %c0_i32, %arg1 : i32, i32, i32
  }
  func.func @transform_2(%arg0: i32, %arg1: i32) -> (i32, i32) {
    %c0_i32 = arith.constant 0 : i32
    %c0_i32_0 = arith.constant 0 : i32
    %c0_i32_1 = arith.constant 0 : i32
    return %c0_i32, %c0_i32_0 : i32, i32
  }
  func.func @transform_3(%arg0: i32, %arg1: i32) -> (i32, i32, i32) {
    %c0_i32 = arith.constant 0 : i32
    %c0_i32_0 = arith.constant 0 : i32
    return %arg0, %c0_i32, %arg1 : i32, i32, i32
  }
}

</mosaic_0001>

<bundles_post_ra>
// kernel: weight_dy_graph_forward.1
= control target key start
LH: loop header
LB: loop body
LE: loop exit
PB: predicated region body
PF: predicated region fallthrough
CT: control target
= control target key end

     0   :  { %s1232_s12 = smov 0   ;;  %s1234_s13 = smov 0   ;;  %s1454_s0 = inlined_call_operand.vmem [shape: f32[2,8,256], index: 0, kind: input, shape index: {}]   ;;  %s1455_s1 = inlined_call_operand.vmem [shape: f32[2,8,256], index: 1, kind: input, shape index: {}]   ;;  %s1456_s2 = inlined_call_operand.vmem [shape: f32[176,49], index: 2, kind: input, shape index: {}]   ;;  %s1457_s3 = inlined_call_operand.vmem [shape: f32[2,16,256], index: 3, kind: output, shape index: {}]  }
   0x1   :  { %s1236_s14 = smov 0  }
   0x2 LB: > { %s25_s15 = sadd.s32 1, %s1203_s13  ;;  %p1104_p0 = scmp.ge.s32.totalorder %s1207_s14, 1  ;;  %s1207_s14 = sphi %s1236_s14, %s13_s14   ;;  %s1203_s13 = sphi %s1234_s13, %s1459_s13   ;;  %s1199_s12 = sphi %s1232_s12, %s1458_s12  }
   0x3   : > { %p27_p1 = scmp.ge.s32.totalorder %s25_s15, 2  ;;  %p175_p2 = scmp.lt.s32.totalorder %s1207_s14, 3 }
   0x5   : > { %s1461_s15 = smov (%p27_p1, %s25_s15), 0  ;;  %p176_p3 = pnand %p1104_p0, %p175_p2 }
   0x6   : > { %p217_p4 = scmp.lt.s32.totalorder (!%p176_p3), %s1199_s12, 1  ;;  %s1209_s20 = smov (!%p176_p3), 120  }
   0x7   : > { %179 = sbr.rel (%p176_p3) target bundleno = 1005 (0x3ed), region = 32 }
   0xc   : > { %v250_v0 = vld [vmem:[%s1456_s2] sm:$0xff]  ;;  %v252_v1 = vld [vmem:[%s1456_s2 + $0x10] sm:$0xff]  ;;  %v251_v2 = vld [vmem:[%s1456_s2 + $0x8] sm:$0xff]  ;;  %s1463_s12 = smov (!%p217_p4, %s1199_s12), 1  ;;  %v1210_v4 = vmov 0.0   ;;  %vm274_vm0 = vcmask 64512  }
   0xd   : > { %262 = vrot.lane.b32.xlu0 %v250_v0, %s1209_s20  ;;  %266 = vrot.lane.b32.xlu1 %v252_v1, %s1209_s20  ;;  %v253_v3 = vld [vmem:[%s1456_s2 + $0x18] sm:$0xff]  ;;  %s1141_s25 = sshll.u32 %s1463_s12, 4  ;;  %v254_v5 = vld [vmem:[%s1456_s2 + $0x20] sm:$0xff]  ;;  %v1211_v11 = vmov 48   ;;  %vm621_vm1 = vcmask 392192   ;;  %vm811_vm2 = vcmask 261120  }
   0xe   : > { %464 = vmatprep.mubr.f32.mxu1 %v1210_v4  ;;  %351 = vmatprep.mubr.f32.mxu0 %v1210_v4  ;;  %s224_s30 = scalar_lea.vmem %s1454_s0, %s1141_s25  ;;  %v255_v6 = vld [vmem:[%s1456_s2 + $0x28] sm:$0xff]  ;;  %s234_s8 = scalar_lea.vmem %s1455_s1, %s1141_s25  ;;  %v1308_v15 = vld [vmem:[%s1456_s2 + $0x40] sm:$0xff]  ;;  %v1317_v16 = vld [vmem:[%s1456_s2 + $0x38] sm:$0xff]  ;;  %vm909_vm3 = vcmask 130048  }
   0xf   : > { %v247_v7 = vld [vmem:[%s224_s30 + $0x8] sm:$0xff]  ;;  %v246_v8 = vld [vmem:[%s224_s30] sm:$0xff]  ;;  %1183 = vset.pattern.permute.xlu0 %v1211_v11  ;;  %1184 = vset.pattern.permute.xlu1 %v1211_v11  ;;  %v1330_v18 = vld [vmem:[%s1456_s2 + $0x78] sm:$0xff]  ;;  %s1143_s22 = sshll.u32 %s1463_s12, 5 }
  0x10   : > { %430 = vmatprep.subr.mxu1 %v247_v7  ;;  %v249_v9 = vld [vmem:[%s234_s8 + $0x8] sm:$0xff]  ;;  %v248_v10 = vld [vmem:[%s234_s8] sm:$0xff]  ;;  %v1342_v20 = vld [vmem:[%s1456_s2 + $0x58] sm:$0xff]  ;;  %s244_s25 = scalar_lea.vmem %s1457_s3, %s1143_s22 }
  0x11   : > { %264 = vrot.lane.b32.xlu0 %v251_v2, %s1209_s20  ;;  %268 = vrot.lane.b32.xlu1 %v253_v3, %s1209_s20  ;;  %v1289_v12 = vld [vmem:[%s1456_s2 + $0x88] sm:$0xff]  ;;  %v1322_v17 = vld [vmem:[%s1456_s2 + $0x80] sm:$0xff] }
  0x12   : > { %431 = vmatpush1.msra.mxu1 %v246_v8  ;;  %317 = vmatprep.subr.mxu0 %v249_v9  ;;  %v1294_v13 = vld [vmem:[%s1456_s2 + $0x48] sm:$0xff]  ;;  %v1335_v19 = vld [vmem:[%s1456_s2 + $0x60] sm:$0xff]  ;;  %v1347_v21 = vld [vmem:[%s1456_s2 + $0x30] sm:$0xff] }
  0x13   : > { %1117 = vmatmul.mubr.msk.f32.vlgmr.msra.gmra.mxu1 %vm274_vm0, %v250_v0  ;;  %318 = vmatpush1.msra.mxu0 %v248_v10  ;;  %v1303_v14 = vld [vmem:[%s1456_s2 + $0x68] sm:$0xff]  ;;  %v1354_v22 = vld [vmem:[%s1456_s2 + $0x50] sm:$0xff]  ;;  %v1371_v25 = vld [vmem:[%s1456_s2 + $0x98] sm:$0xff] }
  0x14   : > { %470 = vmatprep.mubr.f32.mxu1 %v1210_v4  ;;  %v1359_v23 = vld [vmem:[%s1456_s2 + $0x70] sm:$0xff]  ;;  %v1378_v26 = vld [vmem:[%s1456_s2 + $0xa8] sm:$0xff]  ;;  %v1383_v27 = vld [vmem:[%s1456_s2 + $0xa0] sm:$0xff] }
  0x15   : > { %270 = vrot.lane.b32.xlu0 %v254_v5, %s1209_s20  ;;  %272 = vrot.lane.b32.xlu1 %v255_v6, %s1209_s20  ;;  %v1366_v24 = vld [vmem:[%s1456_s2 + $0x90] sm:$0xff] }
  0x17   : > { %1118 = vmatmul.mubr.msk.f32.gmra.mxu1 %vm274_vm0, %v251_v2 }
  0x18   : > { %476 = vmatprep.mubr.f32.mxu1 %v1210_v4 }
  0x19   : > { %522 = vperm.xlu0 %1183, %v255_v6   ;;  %518 = vperm.xlu1 %1184, %v254_v5  }
  0x1b   : > { %1119 = vmatmul.mubr.msk.f32.gmra.mxu1 %vm274_vm0, %v252_v1 }
  0x1c   : > { %482 = vmatprep.mubr.f32.mxu1 %v1210_v4 }
  0x1d   : > { %510 = vperm.xlu0 %1183, %v252_v1   ;;  %514 = vperm.xlu1 %1184, %v253_v3  }
  0x1f   : > { %1120 = vmatmul.mubr.msk.f32.gmra.mxu1 %vm274_vm0, %v253_v3 }
  0x20   : > { %488 = vmatprep.mubr.f32.mxu1 %v1210_v4 }
  0x21   : > { %502 = vperm.xlu0 %1183, %v250_v0   ;;  %506 = vperm.xlu1 %1184, %v251_v2  }
  0x23   : > { %1121 = vmatmul.mubr.msk.f32.gmra.mxu1 %vm274_vm0, %v254_v5 }
  0x24   : > { %494 = vmatprep.mubr.f32.mxu1 %v1210_v4 }
  0x25   : > { %618 = vperm.xlu0 %1183, %v1289_v12   ;;  %578 = vperm.xlu1 %1184, %v1294_v13  }
  0x27   : > { %1122 = vmatmul.mubr.msk.f32.gmra.mxu1 %vm274_vm0, %v255_v6 }
  0x28   : > { %758 = vmatprep.mubr.f32.mxu1 %v1210_v4 }
  0x29   : > { %598 = vperm.xlu0 %1183, %v1303_v14   ;;  %573 = vperm.xlu1 %1184, %v1308_v15  }
  0x2d   : > { %568 = vperm.xlu0 %1183, %v1317_v16   ;;  %613 = vperm.xlu1 %1184, %v1322_v17  }
  0x31   : > { %608 = vperm.xlu0 %1183, %v1330_v18   ;;  %593 = vperm.xlu1 %1184, %v1335_v19  }
  0x35   : > { %588 = vperm.xlu0 %1183, %v1342_v20   ;;  %563 = vperm.xlu1 %1184, %v1347_v21  }
  0x39   : > { %583 = vperm.xlu0 %1183, %v1354_v22   ;;  %603 = vperm.xlu1 %1184, %v1359_v23  }
  0x3d   : > { %803 = vperm.xlu0 %1183, %v1366_v24   ;;  %808 = vperm.xlu1 %1184, %v1371_v25  }
  0x41   : > { %906 = vperm.xlu0 %1183, %v1378_v26   ;;  %901 = vperm.xlu1 %1184, %v1383_v27  }
  0x7f   : > { %v263_v28 = vpop.permute.xlu0 %262  ;;  %v267_v30 = vpop.permute.xlu1 %266 }
  0x80   : > { %1111 = vmatmul.mubr.msk.f32.vlgmr.msra.gmra.mxu0 %vm274_vm0, %v263_v28 }
  0x81   : > { %357 = vmatprep.mubr.f32.mxu0 %v1210_v4 }
  0x83   : > { %v265_v29 = vpop.permute.xlu0 %264  ;;  %v269_v31 = vpop.permute.xlu1 %268 }
  0x84   : > { %1112 = vmatmul.mubr.msk.f32.gmra.mxu0 %vm274_vm0, %v265_v29 }
  0x85   : > { %363 = vmatprep.mubr.f32.mxu0 %v1210_v4 }
  0x87   : > { %v271_v32 = vpop.permute.xlu0 %270  ;;  %v273_v33 = vpop.permute.xlu1 %272 }
  0x88   : > { %1113 = vmatmul.mubr.msk.f32.gmra.mxu0 %vm274_vm0, %v267_v30 }
  0x89   : > { %369 = vmatprep.mubr.f32.mxu0 %v1210_v4 }
  0x8c   : > { %1114 = vmatmul.mubr.msk.f32.gmra.mxu0 %vm274_vm0, %v269_v31 }
  0x8d   : > { %375 = vmatprep.mubr.f32.mxu0 %v1210_v4 }
  0x90   : > { %1115 = vmatmul.mubr.msk.f32.gmra.mxu0 %vm274_vm0, %v271_v32 }
  0x91   : > { %381 = vmatprep.mubr.f32.mxu0 %v1210_v4 }
  0x94   : > { %1116 = vmatmul.mubr.msk.f32.gmra.mxu0 %vm274_vm0, %v273_v33  ;;  %v519_v53 = vpop.permute.xlu1 %518  ;;  %v523_v56 = vpop.permute.xlu0 %522 }
  0x95   : > { %710 = vmatprep.mubr.f32.mxu0 %v1210_v4 }
  0x98   : > { %v515_v1 = vpop.permute.xlu1 %514  ;;  %v511_v8 = vpop.permute.xlu0 %510 }
  0xd3   : > { %v466_v34 = vpop.f32.mrf.mxu1 }
  0xd5   : > { %v468_v35 = vpop.f32.mrf.mxu1 }
  0xd7   : > { %v472_v36 = vpop.f32.mrf.mxu1 }
  0xd9   : > { %v474_v37 = vpop.f32.mrf.mxu1 }
  0xdb   : > { %v478_v38 = vpop.f32.mrf.mxu1 }
  0xdd   : > { %v480_v39 = vpop.f32.mrf.mxu1 }
  0xdf   : > { %v484_v42 = vpop.f32.mrf.mxu1 }
  0xe1   : > { %v486_v45 = vpop.f32.mrf.mxu1 }
  0xe3   : > { %v490_v48 = vpop.f32.mrf.mxu1 }
  0xe5   : > { %v492_v51 = vpop.f32.mrf.mxu1 }
  0xe7   : > { %v496_v55 = vpop.f32.mrf.mxu1 }
  0xe9   : > { %v498_v61 = vpop.f32.mrf.mxu1 }
 0x140   : > { %v353_v40 = vpop.f32.mrf.mxu0 }
 0x142   : > { %v355_v41 = vpop.f32.mrf.mxu0 }
 0x143   : > { %v469_v33 = vadd.f32 %v468_v35, %v355_v41 }
 0x144   : > { %v359_v43 = vpop.f32.mrf.mxu0 }
 0x145   : > { %v473_v30 = vadd.f32 %v472_v36, %v359_v43 }
 0x146   : > { %v361_v44 = vpop.f32.mrf.mxu0 }
 0x147   : > { %v475_v11 = vadd.f32 %v474_v37, %v361_v44  ;;  %v503_v37 = vpop.permute.xlu0 %502 }
 0x148   : > { %v365_v46 = vpop.f32.mrf.mxu0  ;;  %v526_v35 = vadd.f32 %v503_v37, %v469_v33 }
 0x149   : > { %v479_v9 = vadd.f32 %v478_v38, %v365_v46 }
 0x14a   : > { %v367_v47 = vpop.f32.mrf.mxu0 }
 0x14b   : > { %v481_v5 = vadd.f32 %v480_v39, %v367_v47 }
 0x14c   : > { %v371_v49 = vpop.f32.mrf.mxu0 }
 0x14d   : > { %v485_v2 = vadd.f32 %v484_v42, %v371_v49  ;;  %v467_v42 = vadd.f32 %v466_v34, %v353_v40  ;;  %v529_v49 = vadd.f32 %v511_v8, %v479_v9 }
 0x14e   : > { %v373_v50 = vpop.f32.mrf.mxu0 }
 0x14f   : > { %v487_v63 = vadd.f32 %v486_v45, %v373_v50  ;;  %v531_v31 = vadd.f32 %v515_v1, %v485_v2  ;;  %v507_v45 = vpop.permute.xlu1 %506  ;;  %v525_v43 = vadd.f32 %v503_v37, %v467_v42  ;;  %v541_v46 = vmax.f32 %v529_v49, 0.0 }
 0x150   : > { %v377_v52 = vpop.f32.mrf.mxu0  ;;  %v528_v47 = vadd.f32 %v507_v45, %v475_v11  ;;  %v527_v44 = vadd.f32 %v507_v45, %v473_v30  ;;  %v538_v50 = vmax.f32 %v526_v35, 0.0 }
 0x151   : > { %v491_v60 = vadd.f32 %v490_v48, %v377_v52  ;;  %v532_v28 = vadd.f32 %v515_v1, %v487_v63  ;;  %v530_v48 = vadd.f32 %v511_v8, %v481_v5  ;;  %v543_v36 = vmax.f32 %v531_v31, 0.0 }
 0x152   : > { %v379_v54 = vpop.f32.mrf.mxu0  ;;  %v540_v34 = vmax.f32 %v528_v47, 0.0  ;;  %v539_v40 = vmax.f32 %v527_v44, 0.0  ;;  %v537_v52 = vmax.f32 %v525_v43, 0.0 }
 0x153   : > { %v493_v58 = vadd.f32 %v492_v51, %v379_v54  ;;  %v533_v10 = vadd.f32 %v519_v53, %v491_v60  ;;  %v544_v38 = vmax.f32 %v532_v28, 0.0  ;;  %v542_v41 = vmax.f32 %v530_v48, 0.0 }
 0x154   : > { %v383_v57 = vpop.f32.mrf.mxu0 }
 0x155   : > { %v497_v59 = vadd.f32 %v496_v55, %v383_v57  ;;  %v534_v6 = vadd.f32 %v519_v53, %v493_v58  ;;  %v545_v39 = vmax.f32 %v533_v10, 0.0 }
 0x156   : > { %v385_v62 = vpop.f32.mrf.mxu0 }
 0x157   : > { %v499_v0 = vadd.f32 %v498_v61, %v385_v62  ;;  %v535_v3 = vadd.f32 %v523_v56, %v497_v59  ;;  %v546_v51 = vmax.f32 %v534_v6, 0.0 }
 0x159   : > { %v536_v7 = vadd.f32 %v523_v56, %v499_v0  ;;  %v547_v32 = vmax.f32 %v535_v3, 0.0 }
 0x15b   : > { %v548_v29 = vmax.f32 %v536_v7, 0.0 }
 0x15d   : > { %666 = vmatprep.subr.mxu0 %v548_v29  ;;  %1144 = vmatprep.subr.mxu1 %v548_v29 }
 0x15e   : > { %667 = vmatpush1.msra.mxu0 %v547_v32  ;;  %1150 = vmatpush1.msra.mxu1 %v547_v32 }
 0x15f   : > { %668 = vmatprep.subr.mxu0 %v546_v51  ;;  %1145 = vmatprep.subr.mxu1 %v546_v51 }
 0x160   : > { %669 = vmatpush1.msra.mxu0 %v545_v39  ;;  %1151 = vmatpush1.msra.mxu1 %v545_v39 }
 0x161   : > { %670 = vmatprep.subr.mxu0 %v544_v38  ;;  %1146 = vmatprep.subr.mxu1 %v544_v38 }
 0x162   : > { %671 = vmatpush1.msra.mxu0 %v543_v36  ;;  %1152 = vmatpush1.msra.mxu1 %v543_v36 }
 0x163   : > { %672 = vmatprep.subr.mxu0 %v542_v41  ;;  %1147 = vmatprep.subr.mxu1 %v542_v41 }
 0x164   : > { %673 = vmatpush1.msra.mxu0 %v541_v46  ;;  %1153 = vmatpush1.msra.mxu1 %v541_v46 }
 0x165   : > { %674 = vmatprep.subr.mxu0 %v540_v34  ;;  %1148 = vmatprep.subr.mxu1 %v540_v34 }
 0x166   : > { %675 = vmatpush1.msra.mxu0 %v539_v40  ;;  %1154 = vmatpush1.msra.mxu1 %v539_v40 }
 0x167   : > { %676 = vmatprep.subr.mxu0 %v538_v50  ;;  %1149 = vmatprep.subr.mxu1 %v538_v50 }
 0x168   : > { %677 = vmatpush1.msra.mxu0 %v537_v52  ;;  %1155 = vmatpush1.msra.mxu1 %v537_v52 }
 0x169   : > { %1123 = vmatmul.mubr.msk.f32.vlgmr.msra.gmra.mxu0 %vm621_vm1, %v1347_v21  ;;  %1131 = vmatmul.mubr.msk.f32.vlgmr.msra.gmra.mxu1 %vm621_vm1, %v1359_v23 }
 0x16a   : > { %716 = vmatprep.mubr.f32.mxu0 %v1210_v4  ;;  %764 = vmatprep.mubr.f32.mxu1 %v1210_v4 }
 0x16d   : > { %1124 = vmatmul.mubr.msk.f32.gmra.mxu0 %vm621_vm1, %v1317_v16  ;;  %1132 = vmatmul.mubr.msk.f32.gmra.mxu1 %vm621_vm1, %v1330_v18  ;;  %v619_v18 = vpop.permute.xlu0 %618 }
 0x16e   : > { %722 = vmatprep.mubr.f32.mxu0 %v1210_v4  ;;  %770 = vmatprep.mubr.f32.mxu1 %v1210_v4 }
 0x171   : > { %1125 = vmatmul.mubr.msk.f32.gmra.mxu0 %vm621_vm1, %v1308_v15  ;;  %1133 = vmatmul.mubr.msk.f32.gmra.mxu1 %vm621_vm1, %v1322_v17  ;;  %v579_v15 = vpop.permute.xlu1 %578  ;;  %v599_v55 = vpop.permute.xlu0 %598 }
 0x172   : > { %728 = vmatprep.mubr.f32.mxu0 %v1210_v4  ;;  %776 = vmatprep.mubr.f32.mxu1 %v1210_v4 }
 0x175   : > { %1126 = vmatmul.mubr.msk.f32.gmra.mxu0 %vm621_vm1, %v1294_v13  ;;  %1134 = vmatmul.mubr.msk.f32.gmra.mxu1 %vm621_vm1, %v1289_v12  ;;  %v569_v60 = vpop.permute.xlu0 %568 }
 0x176   : > { %734 = vmatprep.mubr.f32.mxu0 %v1210_v4  ;;  %880 = vmatprep.mubr.f32.mxu1 %v1210_v4 }
 0x179   : > { %1127 = vmatmul.mubr.msk.f32.gmra.mxu0 %vm621_vm1, %v1354_v22  ;;  %v609_v2 = vpop.permute.xlu0 %608 }
 0x17a   : > { %740 = vmatprep.mubr.f32.mxu0 %v1210_v4 }
 0x17d   : > { %1128 = vmatmul.mubr.msk.f32.gmra.mxu0 %vm621_vm1, %v1342_v20  ;;  %v574_v20 = vpop.permute.xlu1 %573  ;;  %v589_v11 = vpop.permute.xlu0 %588 }
 0x17e   : > { %746 = vmatprep.mubr.f32.mxu0 %v1210_v4 }
 0x181   : > { %1129 = vmatmul.mubr.msk.f32.gmra.mxu0 %vm621_vm1, %v1335_v19  ;;  %v614_v58 = vpop.permute.xlu1 %613 }
 0x182   : > { %752 = vmatprep.mubr.f32.mxu0 %v1210_v4 }
 0x185   : > { %1130 = vmatmul.mubr.msk.f32.gmra.mxu0 %vm621_vm1, %v1303_v14  ;;  %v594_v63 = vpop.permute.xlu1 %593 }
 0x189   : > { %v564_v7 = vpop.permute.xlu1 %563 }
 0x18d   : > { %v604_v36 = vpop.permute.xlu1 %603 }
 0x229   : > { %v712_v12 = vpop.f32.mrf.mxu0  ;;  %v760_v13 = vpop.f32.mrf.mxu1 }
 0x22a   : > { %v713_v31 = vadd.f32 %v712_v12, %v564_v7  ;;  %v584_v12 = vpop.permute.xlu0 %583 }
 0x22b   : > { %v714_v16 = vpop.f32.mrf.mxu0  ;;  %v762_v17 = vpop.f32.mrf.mxu1 }
 0x22c   : > { %v715_v32 = vadd.f32 %v714_v16, %v564_v7  ;;  %v763_v34 = vadd.f32 %v762_v17, %v604_v36 }
 0x22d   : > { %v718_v21 = vpop.f32.mrf.mxu0  ;;  %v766_v22 = vpop.f32.mrf.mxu1 }
 0x22e   : > { %v719_v35 = vadd.f32 %v718_v21, %v569_v60  ;;  %v767_v41 = vadd.f32 %v766_v22, %v609_v2  ;;  %v784_v21 = vmul.f32 %v763_v34, %v715_v32 }
 0x22f   : > { %v720_v23 = vpop.f32.mrf.mxu0  ;;  %v768_v53 = vpop.f32.mrf.mxu1 }
 0x230   : > { %v721_v51 = vadd.f32 %v720_v23, %v569_v60  ;;  %v769_v47 = vadd.f32 %v768_v53, %v609_v2 }
 0x231   : > { %v724_v54 = vpop.f32.mrf.mxu0  ;;  %v772_v19 = vpop.f32.mrf.mxu1 }
 0x232   : > { %v725_v45 = vadd.f32 %v724_v54, %v574_v20  ;;  %v773_v42 = vadd.f32 %v772_v19, %v614_v58 }
 0x233   : > { %v726_v56 = vpop.f32.mrf.mxu0  ;;  %v774_v14 = vpop.f32.mrf.mxu1 }
 0x234   : > { %v727_v33 = vadd.f32 %v726_v56, %v574_v20  ;;  %v775_v48 = vadd.f32 %v774_v14, %v614_v58  ;;  %v787_v16 = vmul.f32 %v773_v42, %v725_v45  ;;  %v786_v20 = vmul.f32 %v769_v47, %v721_v51 }
 0x235   : > { %v730_v57 = vpop.f32.mrf.mxu0  ;;  %v778_v0 = vpop.f32.mrf.mxu1  ;;  %v785_v56 = vmul.f32 %v767_v41, %v719_v35 }
 0x236   : > { %v731_v28 = vadd.f32 %v730_v57, %v579_v15  ;;  %v779_v29 = vadd.f32 %v778_v0, %v619_v18  ;;  %v788_v40 = vmul.f32 %v775_v48, %v727_v33 }
 0x237   : > { %v732_v59 = vpop.f32.mrf.mxu0  ;;  %v780_v5 = vpop.f32.mrf.mxu1 }
 0x238   : > { %v733_v9 = vadd.f32 %v732_v59, %v579_v15  ;;  %v781_v10 = vadd.f32 %v780_v5, %v619_v18  ;;  %v789_v43 = vmul.f32 %v779_v29, %v731_v28  ;;  %v761_v15 = vadd.f32 %v760_v13, %v604_v36 }
 0x239   : > { %v736_v61 = vpop.f32.mrf.mxu0 }
 0x23a   : > { %v790_v38 = vmul.f32 %v781_v10, %v733_v9  ;;  %v783_v17 = vmul.f32 %v761_v15, %v713_v31 }
 0x23b   : > { %v738_v62 = vpop.f32.mrf.mxu0 }
 0x23c   : > { %v739_v54 = vadd.f32 %v738_v62, %v584_v12  ;;  %v804_v62 = vpop.permute.xlu0 %803 }
 0x23d   : > { %v742_v1 = vpop.f32.mrf.mxu0 }
 0x23e   : > { %v743_v18 = vadd.f32 %v742_v1, %v589_v11  ;;  %v792_v58 = vadd.f32 %v784_v21, %v739_v54 }
 0x23f   : > { %v744_v3 = vpop.f32.mrf.mxu0 }
 0x240   : > { %v745_v50 = vadd.f32 %v744_v3, %v589_v11  ;;  %v793_v57 = vadd.f32 %v785_v56, %v743_v18  ;;  %v907_v28 = vpop.permute.xlu0 %906 }
 0x241   : > { %v748_v6 = vpop.f32.mrf.mxu0 }
 0x242   : > { %v749_v46 = vadd.f32 %v748_v6, %v594_v63  ;;  %v794_v22 = vadd.f32 %v786_v20, %v745_v50 }
 0x243   : > { %v750_v8 = vpop.f32.mrf.mxu0 }
 0x244   : > { %v751_v37 = vadd.f32 %v750_v8, %v594_v63  ;;  %v795_v19 = vadd.f32 %v787_v16, %v749_v46 }
 0x245   : > { %v754_v30 = vpop.f32.mrf.mxu0 }
 0x246   : > { %v755_v49 = vadd.f32 %v754_v30, %v599_v55  ;;  %v796_v53 = vadd.f32 %v788_v40, %v751_v37 }
 0x247   : > { %v756_v39 = vpop.f32.mrf.mxu0 }
 0x248   : > { %v757_v44 = vadd.f32 %v756_v39, %v599_v55  ;;  %v797_v23 = vadd.f32 %v789_v43, %v755_v49  ;;  %v737_v55 = vadd.f32 %v736_v61, %v584_v12  ;;  %v809_v61 = vpop.permute.xlu1 %808 }
 0x24a   : > { %v798_v52 = vadd.f32 %v790_v38, %v757_v44  ;;  %v791_v13 = vadd.f32 %v783_v17, %v737_v55 }
 0x24c   : > { %840 = vmatprep.subr.mxu1 %v798_v52 }
 0x24d   : > { %841 = vmatpush1.msra.mxu1 %v797_v23 }
 0x24e   : > { %842 = vmatprep.subr.mxu1 %v796_v53 }
 0x24f   : > { %843 = vmatpush1.msra.mxu1 %v795_v19 }
 0x250   : > { %844 = vmatprep.subr.mxu1 %v794_v22 }
 0x251   : > { %845 = vmatpush1.msra.mxu1 %v793_v57 }
 0x252   : > { %846 = vmatprep.subr.mxu1 %v792_v58 }
 0x253   : > { %847 = vmatpush1.msra.mxu1 %v791_v13 }
 0x254   : > { %1135 = vmatmul.mubr.msk.f32.vlgmr.msra.gmra.mxu1 %vm811_vm2, %v1366_v24 }
 0x255   : > { %886 = vmatprep.mubr.f32.mxu1 %v1210_v4 }
 0x258   : > { %1136 = vmatmul.mubr.msk.f32.gmra.mxu1 %vm811_vm2, %v1371_v25  ;;  %v902_v25 = vpop.permute.xlu1 %901 }
 0x259   : > { %978 = vmatprep.mubr.f32.mxu1 %v1210_v4 }
 0x314   : > { %v882_v59 = vpop.f32.mrf.mxu1 }
 0x315   : > { %v883_v3 = vadd.f32 %v882_v59, %v804_v62 }
 0x316   : > { %v884_v60 = vpop.f32.mrf.mxu1 }
 0x317   : > { %v885_v1 = vadd.f32 %v884_v60, %v804_v62  ;;  %v893_v7 = vmax.f32 %v883_v3, 0.0 }
 0x318   : > { %v888_v14 = vpop.f32.mrf.mxu1 }
 0x319   : > { %v889_v63 = vadd.f32 %v888_v14, %v809_v61  ;;  %v894_v24 = vmax.f32 %v885_v1, 0.0 }
 0x31a   : > { %v890_v0 = vpop.f32.mrf.mxu1 }
 0x31b   : > { %v891_v2 = vadd.f32 %v890_v0, %v809_v61  ;;  %v895_v6 = vmax.f32 %v889_v63, 0.0 }
 0x31d   : > { %v896_v5 = vmax.f32 %v891_v2, 0.0 }
 0x31f   : > { %942 = vmatprep.subr.mxu1 %v896_v5 }
 0x320   : > { %943 = vmatpush1.msra.mxu1 %v895_v6 }
 0x321   : > { %944 = vmatprep.subr.mxu1 %v894_v24 }
 0x322   : > { %945 = vmatpush1.msra.mxu1 %v893_v7 }
 0x323   : > { %1137 = vmatmul.mubr.msk.f32.vlgmr.msra.gmra.mxu1 %vm909_vm3, %v1383_v27 }
 0x324   : > { %984 = vmatprep.mubr.f32.mxu1 %v1210_v4 }
 0x327   : > { %1138 = vmatmul.mubr.msk.f32.gmra.mxu1 %vm909_vm3, %v1378_v26 }
 0x3e3   : > { %v980_v8 = vpop.f32.mrf.mxu1 }
 0x3e4   : > { %v981_v9 = vadd.f32 %v980_v8, %v902_v25 }
 0x3e5   : > { %v982_v10 = vpop.f32.mrf.mxu1 }
 0x3e6   : > { %991 = vst [vmem:[%s244_s25] sm:$0xff] %v981_v9  ;;  %v983_v11 = vadd.f32 %v982_v10, %v902_v25 }
 0x3e7   : > { %v986_v29 = vpop.f32.mrf.mxu1 }
 0x3e8   : > { %992 = vst [vmem:[%s244_s25 + $0x8] sm:$0xff] %v983_v11  ;;  %v987_v30 = vadd.f32 %v986_v29, %v907_v28 }
 0x3e9   : > { %v988_v27 = vpop.f32.mrf.mxu1 }
 0x3ea   : > { %993 = vst [vmem:[%s244_s25 + $0x10] sm:$0xff] %v987_v30  ;;  %v989_v4 = vadd.f32 %v988_v27, %v907_v28 }
 0x3ec   : > { %994 = vst [vmem:[%s244_s25 + $0x18] sm:$0xff] %v989_v4 }
 0x3ed PF: > { %s13_s14 = sadd.s32 1, %s1207_s14   ;;  %s1458_s12 = smov %s1203_s13 }
 0x3ee   : > { %p10_p5 = scmp.ge.s32.totalorder %s13_s14, 4   ;;  %s1459_s13 = smov %s1461_s15 }
 0x3f0   :  { %12 = sbr.rel (!%p10_p5) target bundleno = 2 (0x2), region = 65 }

</bundles_post_ra>
